<compile_context>
chip_gen: v6e
topology: v6e:2x2x1
jax: 0.10.0
libtpu: 0.0.40
codegen_flags: <defaults>
</compile_context>

<pallas_src>
import functools

import jax
import jax.numpy as jnp
from jax.experimental import pallas as pl
from jax.experimental.pallas import tpu as pltpu

_LANE = 128
_EPS = 1e-5


def _round_up(x, m):
    return ((x + m - 1) // m) * m


def embedding_kernel(tok_ids_ref, pos_ids_ref,        # SMEM scalar-prefetch (flattened ids)
                     tok_hbm, pos_hbm,                # full tables, HBM resident (pl.ANY)
                     gamma_ref, beta_ref,             # (1, Dp) VMEM blocks
                     out_ref,                         # (R, Dp) VMEM output block
                     tok_buf, pos_buf, sem,           # scratch: gather buffers + DMA sems
                     *, d_real):
    rows = out_ref.shape[0]
    base = pl.program_id(0) * rows

    # ---- gather: DMA only the rows this tile needs out of the HBM tables ----
    def issue(r, carry):
        tid = tok_ids_ref[base + r]
        pid = pos_ids_ref[base + r]
        pltpu.make_async_copy(tok_hbm.at[pl.ds(tid, 1), :],
                              tok_buf.at[pl.ds(r, 1), :], sem.at[0]).start()
        pltpu.make_async_copy(pos_hbm.at[pl.ds(pid, 1), :],
                              pos_buf.at[pl.ds(r, 1), :], sem.at[1]).start()
        return carry

    jax.lax.fori_loop(0, rows, issue, 0)

    # Drain: each wait consumes one row-sized completion per stream; after
    # `rows` iterations every gather into tok_buf / pos_buf has landed.
    def drain(r, carry):
        pltpu.make_async_copy(tok_hbm.at[pl.ds(0, 1), :],
                              tok_buf.at[pl.ds(0, 1), :], sem.at[0]).wait()
        pltpu.make_async_copy(pos_hbm.at[pl.ds(0, 1), :],
                              pos_buf.at[pl.ds(0, 1), :], sem.at[1]).wait()
        return carry

    jax.lax.fori_loop(0, rows, drain, 0)

    # ---- add + single-pass LayerNorm over the real feature width ----
    emb = tok_buf[...] + pos_buf[...]                          # (R, Dp) f32
    inv_d = jnp.float32(1.0 / d_real)
    mean = jnp.sum(emb, axis=-1, keepdims=True) * inv_d
    ex2 = jnp.sum(emb * emb, axis=-1, keepdims=True) * inv_d
    var = ex2 - mean * mean
    normed = (emb - mean) * jax.lax.rsqrt(var + _EPS)
    # gamma/beta padded columns are zero -> padded output columns are exactly 0.
    out_ref[...] = (normed * gamma_ref[...] + beta_ref[...]).astype(out_ref.dtype)


def embedding_forward(x_ids, tok_table, pos_table, gamma, beta, *,
                      rows_per_tile=256):
    B, S = x_ids.shape
    V, D = tok_table.shape
    L, _ = pos_table.shape
    assert S <= L, "sequence length must not exceed positional table length"

    Dp = _round_up(D, _LANE)                # lane-dense feature width

    def pad_feat(a):
        a = a.astype(jnp.float32)
        return a if Dp == D else jnp.pad(a, ((0, 0), (0, Dp - D)))

    tok_p = pad_feat(tok_table)
    pos_p = pad_feat(pos_table)
    gamma_p = pad_feat(jnp.reshape(gamma, (1, D)))
    beta_p = pad_feat(jnp.reshape(beta, (1, D)))

    n_rows = B * S
    tile = min(rows_per_tile, _round_up(n_rows, 8))
    n_pad = _round_up(n_rows, tile)

    tok_ids = jnp.pad(x_ids.reshape(n_rows).astype(jnp.int32), (0, n_pad - n_rows))
    pos_ids = jnp.pad(jnp.tile(jnp.arange(S, dtype=jnp.int32), B), (0, n_pad - n_rows))

    out_flat = pl.pallas_call(
        functools.partial(embedding_kernel, d_real=D),
        out_shape=jax.ShapeDtypeStruct((n_pad, Dp), jnp.float32),
        grid_spec=pltpu.PrefetchScalarGridSpec(
            num_scalar_prefetch=2,
            grid=(n_pad // tile,),
            in_specs=[
                pl.BlockSpec(memory_space=pl.ANY),            # token table stays in HBM
                pl.BlockSpec(memory_space=pl.ANY),            # positional table stays in HBM
                pl.BlockSpec((1, Dp), lambda t, *_: (0, 0)),  # LayerNorm gamma
                pl.BlockSpec((1, Dp), lambda t, *_: (0, 0)),  # LayerNorm beta
            ],
            out_specs=pl.BlockSpec((tile, Dp), lambda t, *_: (t, 0)),
            scratch_shapes=[
                pltpu.VMEM((tile, Dp), jnp.float32),          # gathered token rows
                pltpu.VMEM((tile, Dp), jnp.float32),          # gathered position rows
                pltpu.SemaphoreType.DMA((2,)),                # one sem per gather stream
            ],
        ),
        compiler_params=pltpu.CompilerParams(
            dimension_semantics=("parallel",)),
    )(tok_ids, pos_ids, tok_p, pos_p, gamma_p, beta_p)

    return out_flat[:n_rows, :D].reshape(B, S, D)


def reference(x_ids, tok_table, pos_table, gamma, beta):
    S = x_ids.shape[1]
    emb = tok_table[x_ids] + pos_table[jnp.arange(S)][None, :, :]
    mean = jnp.mean(emb, axis=-1, keepdims=True)
    var = jnp.mean(jnp.square(emb - mean), axis=-1, keepdims=True)
    normed = (emb - mean) * jax.lax.rsqrt(var + _EPS)
    return normed * gamma.reshape(1, 1, -1) + beta.reshape(1, 1, -1)


if __name__ == "__main__":
    d_vocabulary, d_model, d_l = 64, 32, 16
    B, S = 2, 8

    key = jax.random.PRNGKey(0)
    k_tok, k_pos, k_g, k_b, k_x = jax.random.split(key, 5)

    tok_table = jax.random.normal(k_tok, (d_vocabulary, d_model), jnp.float32)
    pos_table = jax.random.normal(k_pos, (d_l, d_model), jnp.float32)
    gamma = 1.0 + 0.1 * jax.random.normal(k_g, (d_model,), jnp.float32)
    beta = 0.1 * jax.random.normal(k_b, (d_model,), jnp.float32)
    x_ids = jax.random.randint(k_x, (B, S), 0, d_vocabulary, jnp.int32)

    out = embedding_forward(x_ids, tok_table, pos_table, gamma, beta)
    out = jax.block_until_ready(out)

    ref = reference(x_ids, tok_table, pos_table, gamma, beta)
    assert out.shape == (B, S, d_model)
    assert jnp.allclose(out, ref, atol=1e-4, rtol=1e-4)
    print("KERNEL_OK")
</pallas_src>

<mosaic_0001>
module attributes {stable_mosaic.version = 11 : i64} {
  func.func @embedding_kernel(%arg0: i32, %arg1: memref<16xi32, #tpu.memory_space<smem>>, %arg2: memref<16xi32, #tpu.memory_space<smem>>, %arg3: memref<64x128xf32, #tpu.memory_space<any>>, %arg4: memref<16x128xf32, #tpu.memory_space<any>>, %arg5: memref<1x128xf32, #tpu.memory_space<vmem>>, %arg6: memref<1x128xf32, #tpu.memory_space<vmem>>, %arg7: memref<16x128xf32, #tpu.memory_space<vmem>>, %arg8: memref<16x128xf32, #tpu.memory_space<vmem>>, %arg9: memref<16x128xf32, #tpu.memory_space<vmem>>, %arg10: memref<2x!tpu.dma_semaphore, #tpu.memory_space<semaphore_mem>>) attributes {dimension_semantics = [#tpu.dimension_semantics<parallel>], iteration_bounds = array<i64: 1>, scalar_prefetch = 2 : i64, scratch_operands = 3 : i64, tpu.core_type = #tpu.core_type<tc>, window_params = [{}, {}, {pipeline_mode = #tpu.pipeline_mode<synchronous>, transform_indices = @transform_2, window_bounds = array<i64: 1, 128>}, {pipeline_mode = #tpu.pipeline_mode<synchronous>, transform_indices = @transform_3, window_bounds = array<i64: 1, 128>}, {transform_indices = @transform_4, window_bounds = array<i64: 16, 128>}]} {
    %c16_i32 = arith.constant 16 : i32
    %0 = arith.muli %arg0, %c16_i32 : i32
    %c0_i32 = arith.constant 0 : i32
    %c16_i32_0 = arith.constant 16 : i32
    %1 = arith.addi %c0_i32, %c16_i32_0 : i32
    %c1_i32 = arith.constant 1 : i32
    scf.for %arg11 = %c0_i32 to %1 step %c1_i32  : i32 {
      %31 = arith.addi %0, %arg11 : i32
      %32 = arith.index_cast %31 : i32 to index
      %33 = memref.load %arg1[%32] : memref<16xi32, #tpu.memory_space<smem>>
      %34 = arith.addi %0, %arg11 : i32
      %35 = arith.index_cast %34 : i32 to index
      %36 = memref.load %arg2[%35] : memref<16xi32, #tpu.memory_space<smem>>
      %c0_i32_18 = arith.constant 0 : i32
      %c0_i32_19 = arith.constant 0 : i32
      %37 = tpu.memref_slice %arg3[%33, %c0_i32_19] : memref<64x128xf32, #tpu.memory_space<any>> -> memref<1x128xf32, #tpu.memory_space<any>>
      %c0_i32_20 = arith.constant 0 : i32
      %38 = tpu.memref_slice %arg8[%arg11, %c0_i32_20] : memref<16x128xf32, #tpu.memory_space<vmem>> -> memref<1x128xf32, #tpu.memory_space<vmem>>
      %39 = tpu.memref_slice %arg10[%c0_i32_18] : memref<2x!tpu.dma_semaphore, #tpu.memory_space<semaphore_mem>> -> memref<1x!tpu.dma_semaphore, #tpu.memory_space<semaphore_mem>>
      %40 = tpu.memref_squeeze %39 : memref<1x!tpu.dma_semaphore, #tpu.memory_space<semaphore_mem>> -> memref<!tpu.dma_semaphore, #tpu.memory_space<semaphore_mem>>
      tpu.enqueue_dma source(%37 : memref<1x128xf32, #tpu.memory_space<any>>) target(%38 : memref<1x128xf32, #tpu.memory_space<vmem>>) target_semaphore(%40 : memref<!tpu.dma_semaphore, #tpu.memory_space<semaphore_mem>>)
      %c1_i32_21 = arith.constant 1 : i32
      %c0_i32_22 = arith.constant 0 : i32
      %41 = tpu.memref_slice %arg4[%36, %c0_i32_22] : memref<16x128xf32, #tpu.memory_space<any>> -> memref<1x128xf32, #tpu.memory_space<any>>
      %c0_i32_23 = arith.constant 0 : i32
      %42 = tpu.memref_slice %arg9[%arg11, %c0_i32_23] : memref<16x128xf32, #tpu.memory_space<vmem>> -> memref<1x128xf32, #tpu.memory_space<vmem>>
      %43 = tpu.memref_slice %arg10[%c1_i32_21] : memref<2x!tpu.dma_semaphore, #tpu.memory_space<semaphore_mem>> -> memref<1x!tpu.dma_semaphore, #tpu.memory_space<semaphore_mem>>
      %44 = tpu.memref_squeeze %43 : memref<1x!tpu.dma_semaphore, #tpu.memory_space<semaphore_mem>> -> memref<!tpu.dma_semaphore, #tpu.memory_space<semaphore_mem>>
      tpu.enqueue_dma source(%41 : memref<1x128xf32, #tpu.memory_space<any>>) target(%42 : memref<1x128xf32, #tpu.memory_space<vmem>>) target_semaphore(%44 : memref<!tpu.dma_semaphore, #tpu.memory_space<semaphore_mem>>)
    }
    %c16_i32_1 = arith.constant 16 : i32
    %c0_i32_2 = arith.constant 0 : i32
    %c16_i32_3 = arith.constant 16 : i32
    %2 = arith.addi %c0_i32_2, %c16_i32_3 : i32
    %c1_i32_4 = arith.constant 1 : i32
    scf.for %arg11 = %c0_i32_2 to %2 step %c1_i32_4  : i32 {
      %c0_i32_18 = arith.constant 0 : i32
      %c0_i32_19 = arith.constant 0 : i32
      %c0_i32_20 = arith.constant 0 : i32
      %31 = tpu.memref_slice %arg3[%c0_i32_19, %c0_i32_20] : memref<64x128xf32, #tpu.memory_space<any>> -> memref<1x128xf32, #tpu.memory_space<any>>
      %c0_i32_21 = arith.constant 0 : i32
      %c0_i32_22 = arith.constant 0 : i32
      %32 = tpu.memref_slice %arg8[%c0_i32_21, %c0_i32_22] : memref<16x128xf32, #tpu.memory_space<vmem>> -> memref<1x128xf32, #tpu.memory_space<vmem>>
      %33 = tpu.memref_slice %arg10[%c0_i32_18] : memref<2x!tpu.dma_semaphore, #tpu.memory_space<semaphore_mem>> -> memref<1x!tpu.dma_semaphore, #tpu.memory_space<semaphore_mem>>
      %34 = tpu.memref_squeeze %33 : memref<1x!tpu.dma_semaphore, #tpu.memory_space<semaphore_mem>> -> memref<!tpu.dma_semaphore, #tpu.memory_space<semaphore_mem>>
      tpu.wait_dma2 semaphore(%34 : memref<!tpu.dma_semaphore, #tpu.memory_space<semaphore_mem>>) src(%31 : memref<1x128xf32, #tpu.memory_space<any>>) dst(%32 : memref<1x128xf32, #tpu.memory_space<vmem>>)
      %c1_i32_23 = arith.constant 1 : i32
      %c0_i32_24 = arith.constant 0 : i32
      %c0_i32_25 = arith.constant 0 : i32
      %35 = tpu.memref_slice %arg4[%c0_i32_24, %c0_i32_25] : memref<16x128xf32, #tpu.memory_space<any>> -> memref<1x128xf32, #tpu.memory_space<any>>
      %c0_i32_26 = arith.constant 0 : i32
      %c0_i32_27 = arith.constant 0 : i32
      %36 = tpu.memref_slice %arg9[%c0_i32_26, %c0_i32_27] : memref<16x128xf32, #tpu.memory_space<vmem>> -> memref<1x128xf32, #tpu.memory_space<vmem>>
      %37 = tpu.memref_slice %arg10[%c1_i32_23] : memref<2x!tpu.dma_semaphore, #tpu.memory_space<semaphore_mem>> -> memref<1x!tpu.dma_semaphore, #tpu.memory_space<semaphore_mem>>
      %38 = tpu.memref_squeeze %37 : memref<1x!tpu.dma_semaphore, #tpu.memory_space<semaphore_mem>> -> memref<!tpu.dma_semaphore, #tpu.memory_space<semaphore_mem>>
      tpu.wait_dma2 semaphore(%38 : memref<!tpu.dma_semaphore, #tpu.memory_space<semaphore_mem>>) src(%35 : memref<1x128xf32, #tpu.memory_space<any>>) dst(%36 : memref<1x128xf32, #tpu.memory_space<vmem>>)
    }
    %c0 = arith.constant 0 : index
    %c0_5 = arith.constant 0 : index
    %3 = vector.load %arg8[%c0, %c0_5] : memref<16x128xf32, #tpu.memory_space<vmem>>, vector<16x128xf32>
    %c0_6 = arith.constant 0 : index
    %c0_7 = arith.constant 0 : index
    %4 = vector.load %arg9[%c0_6, %c0_7] : memref<16x128xf32, #tpu.memory_space<vmem>>, vector<16x128xf32>
    %5 = arith.addf %3, %4 : vector<16x128xf32>
    %cst = arith.constant dense<0.000000e+00> : vector<16xf32>
    %6 = vector.multi_reduction <add>, %5, %cst [1] : vector<16x128xf32> to vector<16xf32>
    %7 = vector.shape_cast %6 : vector<16xf32> to vector<16x1xf32>
    %cst_8 = arith.constant 3.125000e-02 : f32
    %8 = vector.broadcast %cst_8 : f32 to vector<16x1xf32>
    %9 = arith.mulf %7, %8 : vector<16x1xf32>
    %10 = arith.mulf %5, %5 : vector<16x128xf32>
    %cst_9 = arith.constant dense<0.000000e+00> : vector<16xf32>
    %11 = vector.multi_reduction <add>, %10, %cst_9 [1] : vector<16x128xf32> to vector<16xf32>
    %12 = vector.shape_cast %11 : vector<16xf32> to vector<16x1xf32>
    %cst_10 = arith.constant 3.125000e-02 : f32
    %13 = vector.broadcast %cst_10 : f32 to vector<16x1xf32>
    %14 = arith.mulf %12, %13 : vector<16x1xf32>
    %15 = arith.mulf %9, %9 : vector<16x1xf32>
    %16 = arith.subf %14, %15 : vector<16x1xf32>
    %17 = vector.broadcast %9 : vector<16x1xf32> to vector<16x128xf32>
    %18 = arith.subf %5, %17 : vector<16x128xf32>
    %cst_11 = arith.constant 9.99999974E-6 : f32
    %19 = vector.broadcast %cst_11 : f32 to vector<16x1xf32>
    %20 = arith.addf %16, %19 : vector<16x1xf32>
    %21 = math.rsqrt %20 : vector<16x1xf32>
    %22 = vector.broadcast %21 : vector<16x1xf32> to vector<16x128xf32>
    %23 = arith.mulf %18, %22 : vector<16x128xf32>
    %c0_12 = arith.constant 0 : index
    %c0_13 = arith.constant 0 : index
    %24 = vector.load %arg5[%c0_12, %c0_13] : memref<1x128xf32, #tpu.memory_space<vmem>>, vector<1x128xf32>
    %25 = vector.broadcast %24 : vector<1x128xf32> to vector<16x128xf32>
    %26 = arith.mulf %23, %25 : vector<16x128xf32>
    %c0_14 = arith.constant 0 : index
    %c0_15 = arith.constant 0 : index
    %27 = vector.load %arg6[%c0_14, %c0_15] : memref<1x128xf32, #tpu.memory_space<vmem>>, vector<1x128xf32>
    %28 = vector.broadcast %27 : vector<1x128xf32> to vector<16x128xf32>
    %29 = arith.addf %26, %28 : vector<16x128xf32>
    %c0_16 = arith.constant 0 : index
    %c0_17 = arith.constant 0 : index
    %30 = vector.load %arg7[%c0_16, %c0_17] : memref<16x128xf32, #tpu.memory_space<vmem>>, vector<16x128xf32>
    tpu.vector_store %arg7[%c0_16, %c0_17], %29 {strides = array<i32>} : memref<16x128xf32, #tpu.memory_space<vmem>>, vector<16x128xf32>,
    return
  }
  func.func @transform_2(%arg0: i32, %arg1: memref<16xi32, #tpu.memory_space<smem>>, %arg2: memref<16xi32, #tpu.memory_space<smem>>) -> (i32, i32) {
    %c0_i32 = arith.constant 0 : i32
    %c0_i32_0 = arith.constant 0 : i32
    %c0_i32_1 = arith.constant 0 : i32
    return %c0_i32, %c0_i32_0 : i32, i32
  }
  func.func @transform_3(%arg0: i32, %arg1: memref<16xi32, #tpu.memory_space<smem>>, %arg2: memref<16xi32, #tpu.memory_space<smem>>) -> (i32, i32) {
    %c0_i32 = arith.constant 0 : i32
    %c0_i32_0 = arith.constant 0 : i32
    %c0_i32_1 = arith.constant 0 : i32
    return %c0_i32, %c0_i32_0 : i32, i32
  }
  func.func @transform_4(%arg0: i32, %arg1: memref<16xi32, #tpu.memory_space<smem>>, %arg2: memref<16xi32, #tpu.memory_space<smem>>) -> (i32, i32) {
    %c0_i32 = arith.constant 0 : i32
    %c0_i32_0 = arith.constant 0 : i32
    return %arg0, %c0_i32 : i32, i32
  }
}

</mosaic_0001>

<bundles_post_ra>
// kernel: tpu_custom_call.1
= control target key start
LH: loop header
LB: loop body
LE: loop exit
PB: predicated region body
PF: predicated region fallthrough
CT: control target
= control target key end

     0   :  { %s311_s21 = smov [#allocation6]   ;;  %s407_s0 = inlined_call_operand.hbm [shape: s32[16], index: 0, kind: input, shape index: {}]   ;;  %s408_s2 = inlined_call_operand.hbm [shape: f32[64,128], index: 2, kind: input, shape index: {}]   ;;  %s409_s3 = inlined_call_operand.hbm [shape: f32[16,128], index: 3, kind: input, shape index: {}]   ;;  %s410_s4 = inlined_call_operand.vmem [shape: f32[1,128], index: 4, kind: input, shape index: {}]   ;;  %s411_s5 = inlined_call_operand.vmem [shape: f32[1,128], index: 5, kind: input, shape index: {}]   ;;  %s412_s6 = inlined_call_operand.hbm [shape: f32[16,128], index: 6, kind: output, shape index: {}]   ;;  %s413_s1 = inlined_call_operand.vmem [shape: s32[16], index: 1, kind: input, shape index: {}]  }
   0x1   :  { %12 = dma.hbm_to_smem %s407_s0, 16, %s311_s21, [#allocation5] }
   0x2   :  { %s13_s26 = sshll.u32 %s413_s1, 4  ;;  %s14_s26 = int_to_ptr.vmem [resolvable:$true] %s13_s26 }
   0x3   :  { %s211_s27 = scalar_lea.vmem %s14_s26, 16  ;;  %p216_p1 = scmp.lt.s32.totalorder %s14_s26, %s14_s26 }
   0x4   :  { %p212_p0 = scmp.ne.s32.totalorder %s14_s26, %s211_s27  ;;  %p217_p2 = scmp.lt.s32.totalorder %s211_s27, %s211_s27 }
   0x6   :  { %p218_p3 = por %p217_p2, %p216_p1 }
   0x8   :  { %p219_p4 = pnand %p218_p3, %p212_p0 }
   0xa   :  { %222 = shalt.err (!%p219_p4)  }
   0xb   :  { %s312_s28 = smov [#allocation7]  }
   0xc   :  { %16 = dma.vmem_to_smem %s14_s26, 16, %s312_s28, [#allocation5] }
   0xd   :  { %295 = dma.done.wait [#allocation5], 32 }
   0xe   :  { %296 = vsyncadd [#allocation5], 4294967264 }
   0xf   :  { %18 = sfence }
  0x10   :  { %19 = vsyncpa [#allocation9], 0  ;;  %s359_s29 = smov 0  }
  0x11 LB: > { %s32_s0 = sld [smem:[#allocation6 + %s305_s29]]  ;;  %s36_s30 = scalar_lea.vmem [#allocation2], %s305_s29  ;;  %s305_s29 = sphi %s359_s29, %s30_s29  }
  0x12   : > { %s366_s1 = sld [smem:[#allocation7 + %s305_s29]]  ;;  %s44_s7 = sshll.u32 %s36_s30, 4  ;;  %s45_s7 = int_to_ptr.vmem [resolvable:$true] %s44_s7 }
  0x13   : > { %s50_s8 = scalar_lea.vmem [#allocation3], %s305_s29  ;;  %s225_s18 = scalar_lea.hbm %s408_s2, 1024 }
  0x14   : > { %s59_s9 = sshll.u32 %s50_s8, 4  ;;  %s370_s9 = int_to_ptr.vmem [resolvable:$true] %s59_s9 }
  0x17   : > { %s172_s10 = sshll.u32 %s32_s0, 4 }
  0x18   : > { %s35_s13 = scalar_lea.hbm %s408_s2, %s172_s10  ;;  %s173_s14 = sshll.u32 %s366_s1, 4 }
  0x19   : > { %s223_s15 = scalar_lea.hbm %s35_s13, 16  ;;  %p226_p6 = scmp.lt.s32.totalorder %s35_s13, %s408_s2 }
  0x1a   : > { %p224_p5 = scmp.ne.s32.totalorder %s35_s13, %s223_s15  ;;  %p227_p7 = scmp.lt.s32.totalorder %s225_s18, %s223_s15 }
  0x1c   : > { %p228_p8 = por %p227_p7, %p226_p6 }
  0x1e   : > { %p229_p9 = pnand %p228_p8, %p224_p5 }
  0x20   : > { %232 = shalt.err (!%p229_p9)  }
  0x21   : > { %s233_s21 = scalar_lea.vmem %s45_s7, 16  ;;  %s313_s22 = smov [#allocation2]  }
  0x22   : > { %p234_p10 = scmp.ne.s32.totalorder %s45_s7, %s233_s21  ;;  %s235_s23 = sshll.u32 %s313_s22, 4  ;;  %s236_s23 = int_to_ptr.vmem [resolvable:$false] %s235_s23 }
  0x23   : > { %s237_s24 = scalar_lea.vmem %s236_s23, 256  ;;  %p238_p11 = scmp.lt.s32.totalorder %s45_s7, %s236_s23 }
  0x24   : > { %p239_p12 = scmp.lt.s32.totalorder %s237_s24, %s233_s21 }
  0x26   : > { %p240_p13 = por %p239_p12, %p238_p11 }
  0x28   : > { %p241_p0 = pnand %p240_p13, %p234_p10 }
  0x2a   : > { %244 = shalt.err (!%p241_p0)  }
  0x2b   : > { %47 = dma.hbm_to_vmem [thread:$0]  %s35_s13, 16, %s45_s7, [#allocation4] }
  0x2c   : > { %s49_s27 = scalar_lea.hbm %s409_s3, %s173_s14  ;;  %s247_s30 = scalar_lea.hbm %s409_s3, 256 }
  0x2d   : > { %s245_s28 = scalar_lea.hbm %s49_s27, 16  ;;  %p248_p2 = scmp.lt.s32.totalorder %s49_s27, %s409_s3 }
  0x2e   : > { %p246_p1 = scmp.ne.s32.totalorder %s49_s27, %s245_s28  ;;  %p249_p3 = scmp.lt.s32.totalorder %s247_s30, %s245_s28 }
  0x30   : > { %p250_p4 = por %p249_p3, %p248_p2 }
  0x32   : > { %p251_p5 = pnand %p250_p4, %p246_p1 }
  0x34   : > { %254 = shalt.err (!%p251_p5)  }
  0x35   : > { %s255_s7 = scalar_lea.vmem %s370_s9, 16  ;;  %s314_s11 = smov [#allocation3]  }
  0x36   : > { %p256_p6 = scmp.ne.s32.totalorder %s370_s9, %s255_s7  ;;  %s257_s12 = sshll.u32 %s314_s11, 4  ;;  %s258_s12 = int_to_ptr.vmem [resolvable:$false] %s257_s12 }
  0x37   : > { %s259_s13 = scalar_lea.vmem %s258_s12, 256  ;;  %p260_p7 = scmp.lt.s32.totalorder %s370_s9, %s258_s12 }
  0x38   : > { %p261_p8 = scmp.lt.s32.totalorder %s259_s13, %s255_s7 }
  0x3a   : > { %p262_p9 = por %p261_p8, %p260_p7 }
  0x3c   : > { %p263_p10 = pnand %p262_p9, %p256_p6 }
  0x3e   : > { %266 = shalt.err (!%p263_p10)  }
  0x3f   : > { %62 = dma.hbm_to_vmem [thread:$0]  %s49_s27, 16, %s370_s9, [#allocation4 + $0x1] }
  0x40   : > { %s30_s29 = sadd.s32 1, %s305_s29  }
  0x41   : > { %p27_p11 = scmp.ge.s32.totalorder %s30_s29, 16  }
  0x42   :  { %s307_s14 = smov (%p27_p11), 0  }
  0x43   :  { %29 = sbr.rel (!%p27_p11) target bundleno = 17 (0x11), region = 57 }
  0x48 LB: > { %297 = dma.done.wait [#allocation4], 16  ;;  %s309_s14 = sphi %s307_s14, %s68_s14  }
  0x49   : > { %298 = vsyncadd [#allocation4], 4294967280 }
  0x4a   : > { %299 = dma.done.wait [#allocation4 + $0x1], 16 }
  0x4b   : > { %300 = vsyncadd [#allocation4 + $0x1], 4294967280  ;;  %s68_s14 = sadd.s32 1, %s309_s14  }
  0x4c   : > { %p65_p12 = scmp.ge.s32.totalorder %s68_s14, 16  }
  0x4d   :  { %v75_v0 = vld [vmem:[#allocation2] sm:$0xff] (%p65_p12)  ;;  %v77_v1 = vld [vmem:[#allocation3] sm:$0xff] (%p65_p12)  ;;  %v76_v2 = vld [vmem:[#allocation2 + $0x8] sm:$0xff] (%p65_p12)  ;;  %s315_s15 = smov (%p65_p12), [#allocation8]  }
  0x4e   :  { %67 = sbr.rel (!%p65_p12) target bundleno = 72 (0x48), region = 68  ;;  %v79_v3 = vadd.f32 (%p65_p12), %v77_v1, %v75_v0  ;;  %v78_v4 = vld [vmem:[#allocation3 + $0x8] sm:$0xff] (%p65_p12)  ;;  %v174_v24 = vld [vmem:[%s410_s4] ss:$0 sm:$0xff] (%p65_p12)  ;;  %s132_s16 = sshll.u32 (%p65_p12), %s315_s15, 4  ;;  %s133_s16 = int_to_ptr.vmem [resolvable:$true] %s132_s16 }
  0x4f   :  { %v80_v5 = vadd.f32 (%p65_p12), %v78_v4, %v76_v2  ;;  %v175_v26 = vld [vmem:[%s411_s5] ss:$0 sm:$0xff] (%p65_p12)  ;;  %s267_s17 = scalar_lea.vmem (%p65_p12), %s133_s16, 256  ;;  %p272_p0 = scmp.lt.s32.totalorder (%p65_p12), %s133_s16, %s133_s16 }
  0x50   :  { %81 = vadd.xlane.f32.xlu0 (%p65_p12), %v79_v3  ;;  %v87_v6 = vmul.f32 (%p65_p12), %v79_v3, %v79_v3  ;;  %p268_p13 = scmp.ne.s32.totalorder (%p65_p12), %s133_s16, %s267_s17  ;;  %p273_p1 = scmp.lt.s32.totalorder (%p65_p12), %s267_s17, %s267_s17 }
  0x51   :  { %v88_v7 = vmul.f32 (%p65_p12), %v80_v5, %v80_v5 }
  0x52   :  { %89 = vadd.xlane.f32.xlu1 (%p65_p12), %v87_v6  ;;  %p274_p2 = por (%p65_p12), %p273_p1, %p272_p0 }
  0x54   :  { %83 = vadd.xlane.f32.xlu0 %v80_v5  ;;  %p275_p3 = pnand %p274_p2, %p268_p13 }
  0x56   :  { %91 = vadd.xlane.f32.xlu1 %v88_v7 }
  0xd9   :  { %v82_v8 = vpop.xlane.xlu0 %81 }
  0xda   :  { %v85_v9 = vmul.f32 0.03125, %v82_v8 }
  0xdb   :  { %v90_v10 = vpop.xlane.xlu1 %89 }
  0xdc   :  { %v95_v11 = vmul.f32 %v85_v9, %v85_v9  ;;  %v93_v12 = vmul.f32 0.03125, %v90_v10  ;;  %v99_v22 = vsub.f32 %v79_v3, %v85_v9 }
  0xdd   :  { %v84_v13 = vpop.xlane.xlu0 %83 }
  0xde   :  { %v97_v14 = vsub.f32 %v93_v12, %v95_v11  ;;  %v86_v15 = vmul.f32 0.03125, %v84_v13 }
  0xdf   :  { %v92_v16 = vpop.xlane.xlu1 %91 }
  0xe0   :  { %v101_v17 = vadd.f32 1e-05, %v97_v14  ;;  %v96_v18 = vmul.f32 %v86_v15, %v86_v15  ;;  %v94_v19 = vmul.f32 0.03125, %v92_v16  ;;  %v100_v27 = vsub.f32 %v80_v5, %v86_v15 }
  0xe2   :  { %199 = vrsqrt.f32 %v101_v17  ;;  %v98_v20 = vsub.f32 %v94_v19, %v96_v18 }
  0xe4   :  { %v102_v21 = vadd.f32 1e-05, %v98_v20 }
  0xe6   :  { %201 = vrsqrt.f32 %v102_v21 }
  0xef   :  { %v200_v23 = vpop.eup %199 }
  0xf0   :  { %v105_v25 = vmul.f32 %v200_v23, %v99_v22 }
  0xf2   :  { %v114_v28 = vmul.f32 %v174_v24, %v105_v25 }
  0xf3   :  { %v202_v29 = vpop.eup %201 }
  0xf4   :  { %v106_v30 = vmul.f32 %v202_v29, %v100_v27  ;;  %v123_v31 = vadd.f32 %v175_v26, %v114_v28 }
  0xf6   :  { %v115_v32 = vmul.f32 %v174_v24, %v106_v30  ;;  %125 = vst [vmem:[#allocation8] sm:$0xff] %v123_v31 }
  0xf8   :  { %v124_v33 = vadd.f32 %v175_v26, %v115_v32 }
  0xfa   :  { %126 = vst [vmem:[#allocation8 + $0x8] sm:$0xff] %v124_v33 }
  0xfb   :  { %278 = shalt.err (!%p275_p3)
}
  0xfc   :  { %s316_s4 = smov 128   ;;  %s317_s5 = smov 8  }
  0xfd   :  { %138 = dma.vmem_to_hbm [thread:$0]  %s133_s16, 256, %s412_s6, [#allocation9], %s316_s4, %s316_s4, %s317_s5  }
  0xfe   :  { %301 = dma.done.wait [#allocation9], 256  }
  0xff   :  { %302 = vsyncadd [#allocation9], 4294967040 }
 0x100   :  { %142 = vsyncpa [#allocation9], 1 }
 0x101   :  { %143 = vsyncmov [#allocation4] }
 0x104   :  { %s144_s20 = vpop.sfrf %143 }
 0x105   :  { %p176_p4 = scmp.ne.s32.totalorder %s144_s20, 0 }
 0x107   :  { %148 = shalt.err (%p176_p4)  }
 0x108   :  { %150 = vsyncmov [#allocation4 + $0x1] }
 0x10b   :  { %s151_s21 = vpop.sfrf %150 }
 0x10c   :  { %p177_p5 = scmp.ne.s32.totalorder %s151_s21, 0 }
 0x10e   :  { %155 = shalt.err (%p177_p5)  }

</bundles_post_ra>
